<compile_context>
chip_gen: v5e
topology: v5e:2x2
jax: 0.10.0
libtpu: 0.0.40
codegen_flags: <defaults>
</compile_context>

<pallas_src>
import functools

import jax
import jax.numpy as jnp
import numpy as np
from jax import lax
from jax.experimental import pallas as pl
from jax.experimental.pallas import tpu as pltpu


def _round_up(x, m):
    return ((x + m - 1) // m) * m


def _fused_loss_kernel(z1s_ref, z1t_ref, z2s_ref, z2t_ref,
                       logits_ref, labels_ref, elog_ref,
                       o_ref, zc_ref, *,
                       temperature, weight, tq, num_strips,
                       with_cls, with_contrast, with_entropy):
    f0 = jnp.float32(0.0)

    # ----- cross-entropy: mean(logsumexp(pred) - pred[label]) ----------------
    if with_cls:
        pred = logits_ref[...].astype(jnp.float32)             # (Bc, C)
        lbl = labels_ref[...]                                   # (Bc, 1) int32
        Bc, C = pred.shape
        m = jnp.max(pred, axis=1, keepdims=True)
        lse = m + jnp.log(jnp.sum(jnp.exp(pred - m), axis=1, keepdims=True))
        col = lax.broadcasted_iota(jnp.int32, (Bc, C), 1)
        picked = jnp.sum(jnp.where(col == lbl, pred, 0.0), axis=1, keepdims=True)
        cls_loss = jnp.mean(lse - picked)
    else:
        cls_loss = f0

    # ----- NT-Xent contrastive loss (strip-wise Gram, log-space) -------------
    if with_contrast:
        B, D = z1s_ref.shape
        n = 4 * B                       # total rows of z = cat(z1, z2)
        half = 2 * B                    # positive partner offset
        n_pad = zc_ref.shape[0]         # rows padded to num_strips * tq
        inv_t = jnp.float32(1.0 / temperature)

        # Normalize each (B, D) slab once, store the normalized rows only.
        # F.normalize(p=2): x / max(||x||, 1e-12) == x * rsqrt(max(||x||^2, 1e-24))
        # NOTE: slab offsets B, 2B, 3B should be multiples of 8 (sublane
        # alignment) for unmasked stores; correctness does not depend on it.
        def _norm_store(src_ref, row_off):
            x = src_ref[...].astype(jnp.float32)
            rss = jnp.sum(x * x, axis=-1, keepdims=True)
            zc_ref[pl.ds(row_off, B), :] = x * lax.rsqrt(
                jnp.maximum(rss, jnp.float32(1e-24)))

        _norm_store(z1s_ref, 0)          # z1 = [z1_src; z1_tgt]
        _norm_store(z1t_ref, B)
        _norm_store(z2s_ref, 2 * B)      # z2 = [z2_src; z2_tgt]
        _norm_store(z2t_ref, 3 * B)
        if n_pad > n:                    # zero (and later mask) padded rows
            zc_ref[pl.ds(n, n_pad - n), :] = jnp.zeros((n_pad - n, D), jnp.float32)

        dn = (((1,), (1,)), ((), ()))    # zq @ zc.T

        def _strip(s, acc):
            q0 = pl.multiple_of(s * tq, tq)
            zq = zc_ref[pl.ds(q0, tq), :]                            # (tq, D)
            cov = lax.dot_general(zq, zc_ref[...], dn,
                                  preferred_element_type=jnp.float32)  # (tq, n_pad)
            row_g = s * tq + lax.broadcasted_iota(jnp.int32, (tq, n_pad), 0)
            colg = lax.broadcasted_iota(jnp.int32, (tq, n_pad), 1)
            # cos-sim <= 1 so shifting the exponent by inv_t keeps every exp <= 1.
            keep = jnp.logical_and(colg != row_g, colg < n)          # drop diag + pad cols
            sim = jnp.where(keep, jnp.exp(cov * inv_t - inv_t), 0.0)
            row_sum = jnp.sum(sim, axis=1, keepdims=True)            # (tq, 1)
            log_neg = inv_t + jnp.log(row_sum)
            # Positive pair: row i <-> row i +/- 2B, taken from the SAME cov
            # strip (same MXU path as the denominator — no cancellation bias).
            partner = jnp.where(row_g < half, row_g + half, row_g - half)
            pos_cov = jnp.sum(jnp.where(colg == partner, cov, 0.0),
                              axis=1, keepdims=True)                 # (tq, 1)
            row_valid = (s * tq + lax.broadcasted_iota(jnp.int32, (tq, 1), 0)) < n
            part = jnp.sum(jnp.where(row_valid, log_neg - inv_t * pos_cov, 0.0))
            return acc + part

        tot = lax.fori_loop(0, num_strips, _strip, f0,
                            unroll=bool(num_strips <= 8))
        # loss = -mean(log(pos / neg)) over the 4B rows
        contrast_loss = tot / jnp.float32(n)
    else:
        contrast_loss = f0

    # ----- entropy of extra logits (only when len(logits) > 1) ---------------
    if with_entropy:
        el = elog_ref[...].astype(jnp.float32)                  # (Be, Ce)
        m2 = jnp.max(el, axis=1, keepdims=True)
        sft = el - m2
        lse2 = jnp.log(jnp.sum(jnp.exp(sft), axis=1, keepdims=True))
        logp = sft - lse2
        p = jnp.exp(logp)
        entropy_loss = jnp.mean(-jnp.sum(p * logp, axis=1, keepdims=True))
    else:
        entropy_loss = f0

    total = cls_loss + jnp.float32(weight) * contrast_loss + entropy_loss

    # Pack all scalars into one lane-dense (1, 128) store.
    lanes = lax.broadcasted_iota(jnp.int32, (1, 128), 1)
    out_vec = jnp.where(lanes == 0, total,
              jnp.where(lanes == 1, contrast_loss,
              jnp.where(lanes == 2, cls_loss,
              jnp.where(lanes == 3, entropy_loss, 0.0))))
    o_ref[...] = out_vec


def contrastive_da_loss_forward(z1_src, z2_src, z1_tgt, z2_tgt, logits, labels,
                                weight=1.0, temperature=0.5):
    """Forward of contrastive_da_loss_with_entropy_minimization (fused kernel)."""
    logits0 = jnp.asarray(logits[0])
    Bc, C = logits0.shape

    with_cls = labels is not None
    with_contrast = z2_src is not None
    with_entropy = len(logits) > 1

    labels_arr = (jnp.asarray(labels).astype(jnp.int32).reshape(Bc, 1)
                  if with_cls else jnp.zeros((Bc, 1), jnp.int32))

    if with_contrast:
        zs = (jnp.asarray(z1_src), jnp.asarray(z1_tgt),
              jnp.asarray(z2_src), jnp.asarray(z2_tgt))
    else:
        dummy = jnp.zeros((8, 128), jnp.float32)   # never read inside the kernel
        zs = (dummy, dummy, dummy, dummy)
    B, D = zs[0].shape

    if with_entropy:
        # Common case len(logits) == 2: no wrapper-side concat / extra HBM pass.
        elog = (jnp.asarray(logits[1]) if len(logits) == 2
                else jnp.concatenate([jnp.asarray(l) for l in logits[1:]], axis=0))
    else:
        elog = jnp.zeros((8, 128), jnp.float32)
    Be, Ce = elog.shape

    # --- contrastive strip tiling (rows of the Gram processed TQ at a time) ---
    n = 4 * B
    # TODO(synk): use 128-row strips on v5e (4x128 MXU); 256 targets v6e/v7x.
    tq = min(256, _round_up(n, 8))
    num_strips = -(-n // tq)
    n_pad = num_strips * tq

    kernel = functools.partial(
        _fused_loss_kernel,
        temperature=float(temperature), weight=float(weight),
        tq=tq, num_strips=num_strips,
        with_cls=with_cls, with_contrast=with_contrast, with_entropy=with_entropy)

    # Explicit scoped-VMEM budget: inputs (double-buffered), zc scratch,
    # one (tq, n_pad) cov strip + exp/mask temporaries, plus slack.
    bytes_in = 4 * (4 * B * D + Bc * C + Bc + Be * Ce)
    need = 2 * bytes_in + 4 * n_pad * D + 4 * 4 * tq * n_pad + (2 << 20)
    vmem_limit = int(min(max(2 * need, 32 * 2 ** 20), 64 * 2 ** 20))

    cost = pl.CostEstimate(
        flops=int(2 * n * n_pad * D + 8 * n * D + 5 * Bc * C + 7 * Be * Ce),
        transcendentals=int(n * n_pad + n + Bc * C + 2 * Be * Ce),
        bytes_accessed=int(bytes_in + 4 * 128))

    out = pl.pallas_call(
        kernel,
        out_shape=jax.ShapeDtypeStruct((1, 128), jnp.float32),
        in_specs=[pl.BlockSpec((B, D), lambda: (0, 0)),
                  pl.BlockSpec((B, D), lambda: (0, 0)),
                  pl.BlockSpec((B, D), lambda: (0, 0)),
                  pl.BlockSpec((B, D), lambda: (0, 0)),
                  pl.BlockSpec((Bc, C), lambda: (0, 0)),
                  pl.BlockSpec((Bc, 1), lambda: (0, 0)),
                  pl.BlockSpec((Be, Ce), lambda: (0, 0))],
        out_specs=pl.BlockSpec((1, 128), lambda: (0, 0)),
        scratch_shapes=[pltpu.VMEM((n_pad, D), jnp.float32)],
        compiler_params=pltpu.CompilerParams(vmem_limit_bytes=vmem_limit),
        cost_estimate=cost,
    )(zs[0], zs[1], zs[2], zs[3], logits0, labels_arr, elog)

    total = out[0, 0]
    contrast_loss = out[0, 1]
    cls_loss = out[0, 2]
    entropy_loss = out[0, 3]
    y_entropy = jnp.float32(0.0)
    return total, contrast_loss, cls_loss, entropy_loss, y_entropy


# ----------------------------------------------------------------------------
# Pure-JAX reference mirroring the PyTorch module (for correctness check).
# ----------------------------------------------------------------------------
def _reference_forward(z1_src, z2_src, z1_tgt, z2_tgt, logits, labels,
                       weight=1.0, temperature=0.5):
    pred = logits[0]
    logp = jax.nn.log_softmax(pred, axis=-1)
    cls = -jnp.mean(jnp.take_along_axis(logp, labels[:, None], axis=1))

    def normalize(x):
        nrm = jnp.maximum(jnp.sqrt(jnp.sum(x * x, axis=-1, keepdims=True)), 1e-12)
        return x / nrm

    z1 = jnp.concatenate([z1_src, z1_tgt], axis=0)
    z2 = jnp.concatenate([z2_src, z2_tgt], axis=0)
    z1n, z2n = normalize(z1), normalize(z2)
    z = jnp.concatenate([z1n, z2n], axis=0)
    n = z.shape[0]
    cov = jnp.dot(z, z.T, precision=lax.Precision.HIGHEST)
    sim = jnp.exp(cov / temperature)
    neg = jnp.sum(sim * (1.0 - jnp.eye(n, dtype=sim.dtype)), axis=-1)
    pos = jnp.exp(jnp.sum(z1n * z2n, axis=-1) / temperature)
    pos = jnp.concatenate([pos, pos], axis=0)
    contrast = -jnp.mean(jnp.log(pos / neg))
    total = cls + weight * contrast
    return total, contrast, cls


if __name__ == "__main__":
    B, D, C = 8, 32, 4
    key = jax.random.PRNGKey(0)
    k1, k2, k3, k4, k5, k6 = jax.random.split(key, 6)

    z1_src = jax.random.normal(k1, (B, D), dtype=jnp.float32)
    z2_src = jax.random.normal(k2, (B, D), dtype=jnp.float32)
    z1_tgt = jax.random.normal(k3, (B, D), dtype=jnp.float32)
    z2_tgt = jax.random.normal(k4, (B, D), dtype=jnp.float32)
    logits0 = jax.random.normal(k5, (B, C), dtype=jnp.float32)
    labels = jax.random.randint(k6, (B,), 0, C, dtype=jnp.int32)

    out = contrastive_da_loss_forward(
        z1_src, z2_src, z1_tgt, z2_tgt, (logits0,), labels,
        weight=1.0, temperature=0.5)
    out = jax.block_until_ready(out)

    ref_total, ref_contrast, ref_cls = _reference_forward(
        z1_src, z2_src, z1_tgt, z2_tgt, (logits0,), labels,
        weight=1.0, temperature=0.5)
    np.testing.assert_allclose(np.asarray(out[0]), np.asarray(ref_total),
                               rtol=5e-4, atol=5e-5)
    np.testing.assert_allclose(np.asarray(out[1]), np.asarray(ref_contrast),
                               rtol=5e-4, atol=5e-5)
    np.testing.assert_allclose(np.asarray(out[2]), np.asarray(ref_cls),
                               rtol=5e-4, atol=5e-5)

    print("KERNEL_OK")
</pallas_src>

<mosaic_0001>
module attributes {stable_mosaic.version = 11 : i64} {
  func.func @_fused_loss_kernel(%arg0: memref<8x32xf32, #tpu.memory_space<vmem>>, %arg1: memref<8x32xf32, #tpu.memory_space<vmem>>, %arg2: memref<8x32xf32, #tpu.memory_space<vmem>>, %arg3: memref<8x32xf32, #tpu.memory_space<vmem>>, %arg4: memref<8x4xf32, #tpu.memory_space<vmem>>, %arg5: memref<8x1xi32, #tpu.memory_space<vmem>>, %arg6: memref<8x128xf32, #tpu.memory_space<vmem>>, %arg7: memref<1x128xf32, #tpu.memory_space<vmem>>, %arg8: memref<32x32xf32, #tpu.memory_space<vmem>>) attributes {dimension_semantics = [], scalar_prefetch = 0 : i64, scratch_operands = 1 : i64, tpu.core_type = #tpu.core_type<tc>} {
    %c0 = arith.constant 0 : index
    %c0_0 = arith.constant 0 : index
    %0 = vector.load %arg4[%c0, %c0_0] : memref<8x4xf32, #tpu.memory_space<vmem>>, vector<8x4xf32>
    %c0_1 = arith.constant 0 : index
    %c0_2 = arith.constant 0 : index
    %1 = vector.load %arg5[%c0_1, %c0_2] : memref<8x1xi32, #tpu.memory_space<vmem>>, vector<8x1xi32>
    %cst = arith.constant dense<0xFF800000> : vector<8xf32>
    %2 = vector.multi_reduction <maximumf>, %0, %cst [1] : vector<8x4xf32> to vector<8xf32>
    %3 = vector.shape_cast %2 : vector<8xf32> to vector<8x1xf32>
    %4 = vector.broadcast %3 : vector<8x1xf32> to vector<8x4xf32>
    %5 = arith.subf %0, %4 : vector<8x4xf32>
    %6 = math.exp %5 : vector<8x4xf32>
    %cst_3 = arith.constant dense<0.000000e+00> : vector<8xf32>
    %7 = vector.multi_reduction <add>, %6, %cst_3 [1] : vector<8x4xf32> to vector<8xf32>
    %8 = vector.shape_cast %7 : vector<8xf32> to vector<8x1xf32>
    %9 = math.log %8 : vector<8x1xf32>
    %10 = arith.addf %3, %9 : vector<8x1xf32>
    %11 = tpu.iota {dimensions = array<i32: 1>} : vector<8x4xi32>
    %12 = vector.broadcast %1 : vector<8x1xi32> to vector<8x4xi32>
    %13 = arith.cmpi eq, %11, %12 : vector<8x4xi32>
    %cst_4 = arith.constant 0.000000e+00 : f32
    %14 = vector.broadcast %cst_4 : f32 to vector<8x4xf32>
    %15 = arith.select %13, %0, %14 : vector<8x4xi1>, vector<8x4xf32>
    %cst_5 = arith.constant dense<0.000000e+00> : vector<8xf32>
    %16 = vector.multi_reduction <add>, %15, %cst_5 [1] : vector<8x4xf32> to vector<8xf32>
    %17 = vector.shape_cast %16 : vector<8xf32> to vector<8x1xf32>
    %18 = arith.subf %10, %17 : vector<8x1xf32>
    %19 = vector.shape_cast %18 : vector<8x1xf32> to vector<1x8x1xf32>
    %cst_6 = arith.constant dense<0.000000e+00> : vector<1xf32>
    %20 = vector.multi_reduction <add>, %19, %cst_6 [1, 2] : vector<1x8x1xf32> to vector<1xf32>
    %21 = vector.shape_cast %20 : vector<1xf32> to vector<1x1x1xf32>
    %22 = vector.extract %21[0, 0, 0] : f32 from vector<1x1x1xf32>
    %cst_7 = arith.constant 8.000000e+00 : f32
    %23 = arith.divf %22, %cst_7 : f32
    %c0_8 = arith.constant 0 : index
    %c0_9 = arith.constant 0 : index
    %24 = vector.load %arg0[%c0_8, %c0_9] : memref<8x32xf32, #tpu.memory_space<vmem>>, vector<8x32xf32>
    %25 = arith.mulf %24, %24 : vector<8x32xf32>
    %cst_10 = arith.constant dense<0.000000e+00> : vector<8xf32>
    %26 = vector.multi_reduction <add>, %25, %cst_10 [1] : vector<8x32xf32> to vector<8xf32>
    %27 = vector.shape_cast %26 : vector<8xf32> to vector<8x1xf32>
    %cst_11 = arith.constant 1.000000e-24 : f32
    %28 = vector.broadcast %cst_11 : f32 to vector<8x1xf32>
    %29 = arith.maximumf %27, %28 : vector<8x1xf32>
    %30 = math.rsqrt %29 : vector<8x1xf32>
    %31 = vector.broadcast %30 : vector<8x1xf32> to vector<8x32xf32>
    %32 = arith.mulf %24, %31 : vector<8x32xf32>
    %c0_12 = arith.constant 0 : index
    %c0_13 = arith.constant 0 : index
    %33 = vector.load %arg8[%c0_12, %c0_13] : memref<32x32xf32, #tpu.memory_space<vmem>>, vector<8x32xf32>
    tpu.vector_store %arg8[%c0_12, %c0_13], %32 {strides = array<i32>} : memref<32x32xf32, #tpu.memory_space<vmem>>, vector<8x32xf32>,
    %c0_14 = arith.constant 0 : index
    %c0_15 = arith.constant 0 : index
    %34 = vector.load %arg1[%c0_14, %c0_15] : memref<8x32xf32, #tpu.memory_space<vmem>>, vector<8x32xf32>
    %35 = arith.mulf %34, %34 : vector<8x32xf32>
    %cst_16 = arith.constant dense<0.000000e+00> : vector<8xf32>
    %36 = vector.multi_reduction <add>, %35, %cst_16 [1] : vector<8x32xf32> to vector<8xf32>
    %37 = vector.shape_cast %36 : vector<8xf32> to vector<8x1xf32>
    %cst_17 = arith.constant 1.000000e-24 : f32
    %38 = vector.broadcast %cst_17 : f32 to vector<8x1xf32>
    %39 = arith.maximumf %37, %38 : vector<8x1xf32>
    %40 = math.rsqrt %39 : vector<8x1xf32>
    %41 = vector.broadcast %40 : vector<8x1xf32> to vector<8x32xf32>
    %42 = arith.mulf %34, %41 : vector<8x32xf32>
    %c8 = arith.constant 8 : index
    %c0_18 = arith.constant 0 : index
    %43 = vector.load %arg8[%c8, %c0_18] : memref<32x32xf32, #tpu.memory_space<vmem>>, vector<8x32xf32>
    tpu.vector_store %arg8[%c8, %c0_18], %42 {strides = array<i32>} : memref<32x32xf32, #tpu.memory_space<vmem>>, vector<8x32xf32>,
    %c0_19 = arith.constant 0 : index
    %c0_20 = arith.constant 0 : index
    %44 = vector.load %arg2[%c0_19, %c0_20] : memref<8x32xf32, #tpu.memory_space<vmem>>, vector<8x32xf32>
    %45 = arith.mulf %44, %44 : vector<8x32xf32>
    %cst_21 = arith.constant dense<0.000000e+00> : vector<8xf32>
    %46 = vector.multi_reduction <add>, %45, %cst_21 [1] : vector<8x32xf32> to vector<8xf32>
    %47 = vector.shape_cast %46 : vector<8xf32> to vector<8x1xf32>
    %cst_22 = arith.constant 1.000000e-24 : f32
    %48 = vector.broadcast %cst_22 : f32 to vector<8x1xf32>
    %49 = arith.maximumf %47, %48 : vector<8x1xf32>
    %50 = math.rsqrt %49 : vector<8x1xf32>
    %51 = vector.broadcast %50 : vector<8x1xf32> to vector<8x32xf32>
    %52 = arith.mulf %44, %51 : vector<8x32xf32>
    %c16 = arith.constant 16 : index
    %c0_23 = arith.constant 0 : index
    %53 = vector.load %arg8[%c16, %c0_23] : memref<32x32xf32, #tpu.memory_space<vmem>>, vector<8x32xf32>
    tpu.vector_store %arg8[%c16, %c0_23], %52 {strides = array<i32>} : memref<32x32xf32, #tpu.memory_space<vmem>>, vector<8x32xf32>,
    %c0_24 = arith.constant 0 : index
    %c0_25 = arith.constant 0 : index
    %54 = vector.load %arg3[%c0_24, %c0_25] : memref<8x32xf32, #tpu.memory_space<vmem>>, vector<8x32xf32>
    %55 = arith.mulf %54, %54 : vector<8x32xf32>
    %cst_26 = arith.constant dense<0.000000e+00> : vector<8xf32>
    %56 = vector.multi_reduction <add>, %55, %cst_26 [1] : vector<8x32xf32> to vector<8xf32>
    %57 = vector.shape_cast %56 : vector<8xf32> to vector<8x1xf32>
    %cst_27 = arith.constant 1.000000e-24 : f32
    %58 = vector.broadcast %cst_27 : f32 to vector<8x1xf32>
    %59 = arith.maximumf %57, %58 : vector<8x1xf32>
    %60 = math.rsqrt %59 : vector<8x1xf32>
    %61 = vector.broadcast %60 : vector<8x1xf32> to vector<8x32xf32>
    %62 = arith.mulf %54, %61 : vector<8x32xf32>
    %c24 = arith.constant 24 : index
    %c0_28 = arith.constant 0 : index
    %63 = vector.load %arg8[%c24, %c0_28] : memref<32x32xf32, #tpu.memory_space<vmem>>, vector<8x32xf32>
    tpu.vector_store %arg8[%c24, %c0_28], %62 {strides = array<i32>} : memref<32x32xf32, #tpu.memory_space<vmem>>, vector<8x32xf32>,
    %cst_29 = arith.constant 2.000000e+00 : f32
    %cst_30 = arith.constant 0.000000e+00 : f32
    %c0_i32 = arith.constant 0 : i32
    %c32_i32 = arith.constant 32 : i32
    %64 = arith.muli %c0_i32, %c32_i32 : i32
    %65 = tpu.assume_multiple %64, 32 : i32
    %66 = arith.index_cast %65 : i32 to index
    %c0_31 = arith.constant 0 : index
    %67 = vector.load %arg8[%66, %c0_31] : memref<32x32xf32, #tpu.memory_space<vmem>>, vector<32x32xf32>
    %c0_32 = arith.constant 0 : index
    %c0_33 = arith.constant 0 : index
    %68 = vector.load %arg8[%c0_32, %c0_33] : memref<32x32xf32, #tpu.memory_space<vmem>>, vector<32x32xf32>
    %cst_34 = arith.constant dense<0.000000e+00> : vector<32x32xf32>
    %69 = tpu.matmul %67, %68, %cst_34 {dimension_numbers = #tpu.dot_dimension_numbers<[1], [1], [0], [0], [0, 0, 1, 0], [], []>} : vector<32x32xf32>, vector<32x32xf32>, vector<32x32xf32> -> vector<32x32xf32>
    %c32_i32_35 = arith.constant 32 : i32
    %70 = arith.muli %c0_i32, %c32_i32_35 : i32
    %71 = tpu.iota {dimensions = array<i32: 0>} : vector<32x32xi32>
    %72 = vector.broadcast %70 : i32 to vector<32x32xi32>
    %73 = arith.addi %72, %71 : vector<32x32xi32>
    %74 = tpu.iota {dimensions = array<i32: 1>} : vector<32x32xi32>
    %75 = arith.cmpi ne, %74, %73 : vector<32x32xi32>
    %c32_i32_36 = arith.constant 32 : i32
    %76 = vector.broadcast %c32_i32_36 : i32 to vector<32x32xi32>
    %77 = arith.cmpi slt, %74, %76 : vector<32x32xi32>
    %78 = arith.andi %75, %77 : vector<32x32xi1>
    %79 = vector.broadcast %cst_29 : f32 to vector<32x32xf32>
    %80 = arith.mulf %69, %79 : vector<32x32xf32>
    %81 = vector.broadcast %cst_29 : f32 to vector<32x32xf32>
    %82 = arith.subf %80, %81 : vector<32x32xf32>
    %83 = math.exp %82 : vector<32x32xf32>
    %cst_37 = arith.constant 0.000000e+00 : f32
    %84 = vector.broadcast %cst_37 : f32 to vector<32x32xf32>
    %85 = arith.select %78, %83, %84 : vector<32x32xi1>, vector<32x32xf32>
    %cst_38 = arith.constant dense<0.000000e+00> : vector<32xf32>
    %86 = vector.multi_reduction <add>, %85, %cst_38 [1] : vector<32x32xf32> to vector<32xf32>
    %87 = vector.shape_cast %86 : vector<32xf32> to vector<32x1xf32>
    %88 = math.log %87 : vector<32x1xf32>
    %89 = vector.broadcast %cst_29 : f32 to vector<32x1xf32>
    %90 = arith.addf %89, %88 : vector<32x1xf32>
    %c16_i32 = arith.constant 16 : i32
    %91 = vector.broadcast %c16_i32 : i32 to vector<32x32xi32>
    %92 = arith.cmpi slt, %73, %91 : vector<32x32xi32>
    %c16_i32_39 = arith.constant 16 : i32
    %93 = vector.broadcast %c16_i32_39 : i32 to vector<32x32xi32>
    %94 = arith.addi %73, %93 : vector<32x32xi32>
    %c16_i32_40 = arith.constant 16 : i32
    %95 = vector.broadcast %c16_i32_40 : i32 to vector<32x32xi32>
    %96 = arith.subi %73, %95 : vector<32x32xi32>
    %97 = arith.select %92, %94, %96 : vector<32x32xi1>, vector<32x32xi32>
    %98 = arith.cmpi eq, %74, %97 : vector<32x32xi32>
    %cst_41 = arith.constant 0.000000e+00 : f32
    %99 = vector.broadcast %cst_41 : f32 to vector<32x32xf32>
    %100 = arith.select %98, %69, %99 : vector<32x32xi1>, vector<32x32xf32>
    %cst_42 = arith.constant dense<0.000000e+00> : vector<32xf32>
    %101 = vector.multi_reduction <add>, %100, %cst_42 [1] : vector<32x32xf32> to vector<32xf32>
    %102 = vector.shape_cast %101 : vector<32xf32> to vector<32x1xf32>
    %c32_i32_43 = arith.constant 32 : i32
    %103 = arith.muli %c0_i32, %c32_i32_43 : i32
    %104 = tpu.iota {dimensions = array<i32: 0>} : vector<32x1xi32>
    %105 = vector.broadcast %103 : i32 to vector<32x1xi32>
    %106 = arith.addi %105, %104 : vector<32x1xi32>
    %c32_i32_44 = arith.constant 32 : i32
    %107 = vector.broadcast %c32_i32_44 : i32 to vector<32x1xi32>
    %108 = arith.cmpi slt, %106, %107 : vector<32x1xi32>
    %109 = vector.broadcast %cst_29 : f32 to vector<32x1xf32>
    %110 = arith.mulf %109, %102 : vector<32x1xf32>
    %111 = arith.subf %90, %110 : vector<32x1xf32>
    %cst_45 = arith.constant 0.000000e+00 : f32
    %112 = vector.broadcast %cst_45 : f32 to vector<32x1xf32>
    %113 = arith.select %108, %111, %112 : vector<32x1xi1>, vector<32x1xf32>
    %114 = vector.shape_cast %113 : vector<32x1xf32> to vector<1x32x1xf32>
    %cst_46 = arith.constant dense<0.000000e+00> : vector<1xf32>
    %115 = vector.multi_reduction <add>, %114, %cst_46 [1, 2] : vector<1x32x1xf32> to vector<1xf32>
    %116 = vector.shape_cast %115 : vector<1xf32> to vector<1x1x1xf32>
    %117 = vector.extract %116[0, 0, 0] : f32 from vector<1x1x1xf32>
    %118 = arith.addf %cst_30, %117 : f32
    %c1_i32 = arith.constant 1 : i32
    %cst_47 = arith.constant 3.200000e+01 : f32
    %119 = arith.divf %118, %cst_47 : f32
    %cst_48 = arith.constant 1.000000e+00 : f32
    %120 = arith.mulf %cst_48, %119 : f32
    %121 = arith.addf %23, %120 : f32
    %cst_49 = arith.constant 0.000000e+00 : f32
    %122 = arith.addf %121, %cst_49 : f32
    %123 = tpu.iota {dimensions = array<i32: 1>} : vector<1x128xi32>
    %c0_i32_50 = arith.constant 0 : i32
    %124 = vector.broadcast %c0_i32_50 : i32 to vector<1x128xi32>
    %125 = arith.cmpi eq, %123, %124 : vector<1x128xi32>
    %c1_i32_51 = arith.constant 1 : i32
    %126 = vector.broadcast %c1_i32_51 : i32 to vector<1x128xi32>
    %127 = arith.cmpi eq, %123, %126 : vector<1x128xi32>
    %c2_i32 = arith.constant 2 : i32
    %128 = vector.broadcast %c2_i32 : i32 to vector<1x128xi32>
    %129 = arith.cmpi eq, %123, %128 : vector<1x128xi32>
    %c3_i32 = arith.constant 3 : i32
    %130 = vector.broadcast %c3_i32 : i32 to vector<1x128xi32>
    %131 = arith.cmpi eq, %123, %130 : vector<1x128xi32>
    %cst_52 = arith.constant 0.000000e+00 : f32
    %cst_53 = arith.constant 0.000000e+00 : f32
    %132 = vector.broadcast %cst_52 : f32 to vector<1x128xf32>
    %133 = vector.broadcast %cst_53 : f32 to vector<1x128xf32>
    %134 = arith.select %131, %132, %133 : vector<1x128xi1>, vector<1x128xf32>
    %135 = vector.broadcast %23 : f32 to vector<1x128xf32>
    %136 = arith.select %129, %135, %134 : vector<1x128xi1>, vector<1x128xf32>
    %137 = vector.broadcast %119 : f32 to vector<1x128xf32>
    %138 = arith.select %127, %137, %136 : vector<1x128xi1>, vector<1x128xf32>
    %139 = vector.broadcast %122 : f32 to vector<1x128xf32>
    %140 = arith.select %125, %139, %138 : vector<1x128xi1>, vector<1x128xf32>
    %c0_54 = arith.constant 0 : index
    %c0_55 = arith.constant 0 : index
    %141 = vector.load %arg7[%c0_54, %c0_55] : memref<1x128xf32, #tpu.memory_space<vmem>>, vector<1x128xf32>
    tpu.vector_store %arg7[%c0_54, %c0_55], %140 {strides = array<i32>} : memref<1x128xf32, #tpu.memory_space<vmem>>, vector<1x128xf32>,
    return
  }
}

</mosaic_0001>

<bundles_post_ra>
// kernel: tpu_custom_call.1
= control target key start
LH: loop header
LB: loop body
LE: loop exit
PB: predicated region body
PF: predicated region fallthrough
CT: control target
= control target key end

     0   :  { %12 = vsyncpa [#allocation4], 0  ;;  %s715_s0 = inlined_call_operand.vmem [shape: f32[8,32], index: 0, kind: input, shape index: {}]   ;;  %s716_s1 = inlined_call_operand.vmem [shape: f32[8,32], index: 1, kind: input, shape index: {}]   ;;  %s717_s2 = inlined_call_operand.hbm [shape: f32[8,32], index: 2, kind: input, shape index: {}]   ;;  %s718_s3 = inlined_call_operand.hbm [shape: f32[8,32], index: 3, kind: input, shape index: {}]   ;;  %s719_s4 = inlined_call_operand.vmem [shape: f32[8,4], index: 4, kind: input, shape index: {}]   ;;  %s720_s5 = inlined_call_operand.vmem [shape: s32[8,1], index: 5, kind: input, shape index: {}]   ;;  %s721_s6 = inlined_call_operand.vmem [shape: f32[8,128], index: 6, kind: input, shape index: {}]   ;;  %s722_s7 = inlined_call_operand.hbm [shape: f32[1,128], index: 7, kind: output, shape index: {}]  }
   0x1   :  { %13 = vsyncpa [#allocation7], 0 }
   0x2   :  { %14 = vsyncpa [#allocation5], 0  ;;  %s24_s26 = sshll.u32 %s717_s2, 4  ;;  %s552_s27 = smov [#allocation3]   ;;  %s25_s26 = int_to_ptr.hbm [resolvable:$true] %s24_s26 }
   0x3   :  { %s26_s28 = sshll.u32 %s552_s27, 4  ;;  %s35_s8 = sshll.u32 %s718_s3, 4  ;;  %s27_s28 = int_to_ptr.vmem [resolvable:$true] %s26_s28  ;;  %s36_s8 = int_to_ptr.hbm [resolvable:$true] %s35_s8 }
   0x4   :  { %29 = dma.hbm_to_vmem [thread:$0]  %s25_s26, 128, %s27_s28, [#allocation4]  }
   0x5   :  { %s553_s6 = smov [#allocation6]  }
   0x6   :  { %s37_s9 = sshll.u32 %s553_s6, 4  ;;  %s38_s9 = int_to_ptr.vmem [resolvable:$true] %s37_s9 }
   0x7   :  { %40 = dma.hbm_to_vmem [thread:$0]  %s36_s8, 128, %s38_s9, [#allocation7]  }
   0x8   :  { %546 = dma.done.wait [#allocation4], 128  }
   0x9   :  { %547 = vsyncadd [#allocation4], 4294967168 }
   0xa   :  { %548 = dma.done.wait [#allocation7], 128  }
   0xb   :  { %549 = vsyncadd [#allocation7], 4294967168  ;;  %vm57_vm0 = vcmask 31744   ;;  %vm103_vm1 = vcmask 261120   ;;  %v604_v0 = vld [vmem:[#allocation6] sm:$0xff]  ;;  %v609_v1 = vld [vmem:[%s716_s1] sm:$0xff] }
   0xc   :  { %v157_v2 = vmul.f32 %v604_v0, %v604_v0  ;;  %v121_v3 = vmul.f32 %v609_v1, %v609_v1  ;;  %v618_v4 = vld [vmem:[%s719_s4] sm:$0xff]  ;;  %v554_v46 = vmov 0   ;;  %s557_s18 = smov [#allocation8]   ;;  %s388_s22 = sshll.u32 %s722_s7, 4  ;;  %s389_s22 = int_to_ptr.hbm [resolvable:$true] %s388_s22 }
   0xd   :  { %v620_v5 = vld [vmem:[#allocation3] sm:$0xff]  ;;  %v58_v7 = vsel %vm57_vm0, %v618_v4, -inf  ;;  %440 = vset.pattern.permute.xlu2 %v554_v46  ;;  %441 = vset.pattern.permute.xlu0 %v554_v46  ;;  %s386_s19 = sshll.u32 %s557_s18, 4  ;;  %s387_s19 = int_to_ptr.vmem [resolvable:$true] %s386_s19 }
   0xe   :  { %v625_v6 = vld [vmem:[%s715_s0] sm:$0xff]  ;;  %v158_v8 = vsel %vm103_vm1, %v157_v2, 0.0  ;;  %v122_v9 = vsel %vm103_vm1, %v121_v3, 0.0  ;;  %59 = vmax.xlane.f32.xlu2 %v58_v7  ;;  %v139_v10 = vmul.f32 %v620_v5, %v620_v5 }
   0xf   :  { %159 = vadd.xlane.f32.xlu0 %v158_v8  ;;  %123 = vadd.xlane.f32.xlu1 %v122_v9  ;;  %v102_v11 = vmul.f32 %v625_v6, %v625_v6  ;;  %v56_v43 = vld [vmem:[%s720_s5] sm:$0xff] }
  0x10   :  { %v140_v12 = vsel %vm103_vm1, %v139_v10, 0.0 }
  0x11   :  { %v104_v13 = vsel %vm103_vm1, %v102_v11, 0.0 }
  0x17   :  { %141 = vadd.xlane.f32.xlu0 %v140_v12  ;;  %105 = vadd.xlane.f32.xlu1 %v104_v13 }
  0x26   :  { %73 = vperm.xlu2 %440, %v56_v43  }
  0x81   :  { %v637_v18 = vpop.xlane.xlu2 %59 }
  0x82   :  { %v160_v14 = vpop.xlane.xlu0 %159  ;;  %v124_v15 = vpop.xlane.xlu1 %123  ;;  %v61_v19 = vsub.f32 %v618_v4, %v637_v18 }
  0x83   :  { %v161_v16 = vmax.f32 %v160_v14, 1e-24  ;;  %v125_v17 = vmax.f32 %v124_v15, 1e-24 }
  0x84   :  { %v62_v20 = vmul.f32 1.442695, %v61_v19 }
  0x85   :  { %442 = vrsqrt.f32 %v161_v16  ;;  %vm132_vm3 = vweird.f32 %v125_v17  ;;  %vm168_vm5 = vweird.f32 %v161_v16 }
  0x86   :  { %444 = vrsqrt.f32 %v125_v17 }
  0x87   :  { %446 = vpow2.f32 %v62_v20 }
  0x8a   :  { %v142_v21 = vpop.xlane.xlu0 %141  ;;  %v106_v22 = vpop.xlane.xlu1 %105 }
  0x8b   :  { %v443_v23 = vpop.eup %442  ;;  %v143_v24 = vmax.f32 %v142_v21, 1e-24  ;;  %v107_v25 = vmax.f32 %v106_v22, 1e-24 }
  0x8c   :  { %v445_v26 = vpop.eup %444  ;;  %v163_v27 = vmul.f32 %v443_v23, %v161_v16  ;;  %vm169_vm2 = vweird.f32 %v443_v23 }
  0x8d   :  { %v127_v28 = vmul.f32 %v445_v26, %v125_v17  ;;  %448 = vrsqrt.f32 %v143_v24  ;;  %v447_v32 = vpop.eup %446  ;;  %vm133_vm4 = vweird.f32 %v445_v26  ;;  %vm170_vm6 = vmor %vm168_vm5, %vm169_vm2  ;;  %vm114_vm9 = vweird.f32 %v107_v25 }
  0x8e   :  { %v164_v29 = vmul.f32 %v443_v23, %v163_v27  ;;  %450 = vrsqrt.f32 %v107_v25  ;;  %v64_v40 = vsel %vm57_vm0, %v447_v32, 0.0  ;;  %vm134_vm7 = vmor %vm132_vm3, %vm133_vm4  ;;  %vm150_vm11 = vweird.f32 %v143_v24 }
  0x8f   :  { %v128_v30 = vmul.f32 %v445_v26, %v127_v28  ;;  %65 = vadd.xlane.f32.xlu0 %v64_v40 }
  0x90   :  { %v165_v31 = vmul.f32 0.5, %v164_v29 }
  0x91   :  { %v129_v33 = vmul.f32 0.5, %v128_v30 }
  0x92   :  { %v166_v34 = vsub.f32 1.5, %v165_v31 }
  0x93   :  { %v449_v35 = vpop.eup %448  ;;  %v130_v36 = vsub.f32 1.5, %v129_v33 }
  0x94   :  { %v451_v37 = vpop.eup %450  ;;  %v167_v38 = vmul.f32 %v443_v23, %v166_v34  ;;  %v145_v39 = vmul.f32 %v449_v35, %v143_v24  ;;  %vm151_vm8 = vweird.f32 %v449_v35 }
  0x95   :  { %v131_v41 = vmul.f32 %v445_v26, %v130_v36  ;;  %v109_v42 = vmul.f32 %v451_v37, %v107_v25  ;;  %vm115_vm10 = vweird.f32 %v451_v37  ;;  %vm152_vm12 = vmor %vm150_vm11, %vm151_vm8 }
  0x96   :  { %v171_v44 = vsel %vm170_vm6, %v443_v23, %v167_v38  ;;  %v146_v45 = vmul.f32 %v449_v35, %v145_v39  ;;  %vm116_vm13 = vmor %vm114_vm9, %vm115_vm10 }
  0x97   :  { %v172_v47 = vmul.f32 %v171_v44, %v604_v0  ;;  %v135_v48 = vsel %vm134_vm7, %v445_v26, %v131_v41  ;;  %v110_v49 = vmul.f32 %v451_v37, %v109_v42  ;;  %v74_v41 = vpop.permute.xlu2 %73 }
  0x98   :  { %v136_v50 = vmul.f32 %v135_v48, %v609_v1  ;;  %v147_v51 = vmul.f32 0.5, %v146_v45  ;;  %v70_v1 = vlaneseq }
  0x99   :  { %173 = vst.msk [vmem:[#allocation2 + $0x18] sm:$0xff] %vm103_vm1, %v172_v47  ;;  %v111_v52 = vmul.f32 0.5, %v110_v49 }
  0x9a   :  { %137 = vst.msk [vmem:[#allocation2 + $0x8] sm:$0xff] %vm103_vm1, %v136_v50  ;;  %v148_v53 = vsub.f32 1.5, %v147_v51  ;;  %v236_v2 = vshrl.u32 %v70_v1, 7 }
  0x9b   :  { %v112_v54 = vsub.f32 1.5, %v111_v52 }
  0x9c   :  { %v149_v55 = vmul.f32 %v449_v35, %v148_v53  ;;  %v237_v3 = vadd.s32 8, %v236_v2  ;;  %v238_v27 = vadd.s32 16, %v236_v2  ;;  %v239_v29 = vadd.s32 24, %v236_v2 }
  0x9d   :  { %v113_v56 = vmul.f32 %v451_v37, %v112_v54 }
  0x9e   :  { %v153_v57 = vsel %vm152_vm12, %v449_v35, %v149_v55  ;;  %v413_v43 = vadd.s32 4294967280, %v239_v29 }
  0x9f   :  { %v154_v58 = vmul.f32 %v153_v57, %v620_v5  ;;  %v117_v59 = vsel %vm116_vm13, %v451_v37, %v113_v56  ;;  %v673_v5 = vand.u32 127, %v70_v1 }
  0xa0   :  { %v118_v60 = vmul.f32 %v117_v59, %v625_v6  ;;  %v181_v61 = vld [vmem:[#allocation2 + $0x18] sm:$0xff]  ;;  %v297_v6 = vadd.s32 16, %v237_v3 }
  0xa1   :  { %155 = vst.msk [vmem:[#allocation2 + $0x10] sm:$0xff] %vm103_vm1, %v154_v58  ;;  %399 = vmatpush.xpose.msk.msra.mxu0 %vm103_vm1, %v181_v61  ;;  %414 = vmatpush.xpose.msk.msra.mxu1 %vm103_vm1, %v181_v61  ;;  %v179_v63 = vld [vmem:[#allocation2 + $0x8] sm:$0xff]  ;;  %vm244_vm15 = vcmp.lt.s32.totalorder %v673_v5, 32  ;;  %vm240_vm2 = vcmp.ne.s32.totalorder %v673_v5, %v236_v2  ;;  %vm241_vm3 = vcmp.ne.s32.totalorder %v673_v5, %v237_v3 }
  0xa2   :  { %119 = vst.msk [vmem:[#allocation2] sm:$0xff] %vm103_vm1, %v118_v60  ;;  %415 = vmatpush.xpose.msk.msra.mxu2 %vm103_vm1, %v181_v61  ;;  %416 = vmatpush.xpose.msk.msra.mxu3 %vm103_vm1, %v181_v61  ;;  %vm308_vm14 = vcmp.eq.s32.totalorder %v673_v5, %v297_v6  ;;  %vm245_vm4 = vmand %vm240_vm2, %vm244_vm15  ;;  %vm242_vm6 = vcmp.ne.s32.totalorder %v673_v5, %v238_v27  ;;  %vm372_vm2 = vcmp.eq.s32.totalorder %v673_v5, 1 }
  0xa3   :  { %vm246_vm5 = vmand %vm241_vm3, %vm244_vm15  ;;  %vm243_vm7 = vcmp.ne.s32.totalorder %v673_v5, %v239_v29  ;;  %vm309_vm10 = vcmp.eq.s32.totalorder %v673_v5, %v236_v2  ;;  %vm307_vm11 = vcmp.eq.s32.totalorder %v673_v5, %v238_v27  ;;  %vm75_vm12 = vcmp.eq.s32.totalorder %v673_v5, %v74_v41 }
  0xa4   :  { %vm247_vm8 = vmand %vm242_vm6, %vm244_vm15  ;;  %vm310_vm13 = vcmp.eq.s32.totalorder %v673_v5, %v413_v43  ;;  %v76_v46 = vsel %vm75_vm12, %v618_v4, 0.0  ;;  %vm371_vm3 = vcmp.eq.s32.totalorder %v673_v5, 0 }
  0xa5   :  { %vm248_vm9 = vmand %vm243_vm7, %vm244_vm15  ;;  %v77_v48 = vsel %vm57_vm0, %v76_v46, 0.0  ;;  %vm81_vm0 = vcmask 7168   ;;  %vm373_vm15 = vcmp.eq.s32.totalorder %v673_v5, 2 }
  0xa8   :  { %v180_v62 = vld [vmem:[#allocation2 + $0x10] sm:$0xff] }
  0xa9   :  { %400 = vmatpush.xpose.msk.msra.mxu0 %vm103_vm1, %v180_v62  ;;  %417 = vmatpush.xpose.msk.msra.mxu1 %vm103_vm1, %v180_v62  ;;  %v178_v0 = vld [vmem:[#allocation2] sm:$0xff] }
  0xaa   :  { %418 = vmatpush.xpose.msk.msra.mxu2 %vm103_vm1, %v180_v62  ;;  %419 = vmatpush.xpose.msk.msra.mxu3 %vm103_vm1, %v180_v62 }
  0xad   :  { %401 = vmatpush.xpose.msk.msra.mxu0 %vm103_vm1, %v179_v63  ;;  %420 = vmatpush.xpose.msk.msra.mxu1 %vm103_vm1, %v179_v63 }
  0xae   :  { %421 = vmatpush.xpose.msk.msra.mxu2 %vm103_vm1, %v179_v63  ;;  %422 = vmatpush.xpose.msk.msra.mxu3 %vm103_vm1, %v179_v63 }
  0xb1   :  { %402 = vmatpush.xpose.msk.msra.mxu0 %vm103_vm1, %v178_v0  ;;  %423 = vmatpush.xpose.msk.msra.mxu1 %vm103_vm1, %v178_v0 }
  0xb2   :  { %424 = vmatpush.xpose.msk.msra.mxu2 %vm103_vm1, %v178_v0  ;;  %425 = vmatpush.xpose.msk.msra.mxu3 %vm103_vm1, %v178_v0 }
  0xb4   :  { %403 = vmatmul.msk.f32.vlgmr.msra.gmra.mxu0 %vm103_vm1, %v178_v0  ;;  %404 = vmatmul.msk.f32.vlgmr.msra.gmra.mxu1 %vm103_vm1, %v179_v63 }
  0xb5   :  { %405 = vmatmul.msk.f32.vlgmr.msra.gmra.mxu2 %vm103_vm1, %v180_v62  ;;  %406 = vmatmul.msk.f32.vlgmr.msra.gmra.mxu3 %vm103_vm1, %v181_v61 }
 0x102   :  { %v66_v50 = vpop.xlane.xlu0 %65 }
 0x131   :  { %v223_v7 = vpop.f32.mrf.mxu0  ;;  %v226_v8 = vpop.f32.mrf.mxu1 }
 0x132   :  { %v249_v9 = vmul.f32 2.0, %v223_v7  ;;  %v250_v10 = vmul.f32 2.0, %v226_v8  ;;  %v312_v11 = vsel %vm308_vm14, %v226_v8, 0.0  ;;  %v311_v42 = vsel %vm307_vm11, %v223_v7, 0.0 }
 0x133   :  { %v318_v12 = vsel %vm103_vm1, %v312_v11, 0.0  ;;  %v315_v45 = vsel %vm103_vm1, %v311_v42, 0.0 }
 0x134   :  { %v407_v13 = vadd.f32 -2.0, %v249_v9  ;;  %v408_v14 = vadd.f32 -2.0, %v250_v10  ;;  %319 = vadd.xlane.f32.xlu2 %v318_v12 }
 0x136   :  { %v257_v15 = vmul.f32 1.442695, %v407_v13  ;;  %v259_v16 = vmul.f32 1.442695, %v408_v14 }
 0x138   :  { %452 = vpow2.f32 %v257_v15  ;;  %v229_v17 = vpop.f32.mrf.mxu2  ;;  %v232_v19 = vpop.f32.mrf.mxu3 }
 0x139   :  { %454 = vpow2.f32 %v259_v16  ;;  %v251_v20 = vmul.f32 2.0, %v229_v17  ;;  %v252_v21 = vmul.f32 2.0, %v232_v19  ;;  %v313_v40 = vsel %vm309_vm10, %v229_v17, 0.0 }
 0x13a   :  { %v321_v44 = vsel %vm103_vm1, %v313_v40, 0.0  ;;  %v314_v47 = vsel %vm310_vm13, %v232_v19, 0.0 }
 0x13b   :  { %v409_v22 = vadd.f32 -2.0, %v251_v20  ;;  %v410_v23 = vadd.f32 -2.0, %v252_v21  ;;  %v324_v49 = vsel %vm103_vm1, %v314_v47, 0.0 }
 0x13d   :  { %v261_v24 = vmul.f32 1.442695, %v409_v22  ;;  %v263_v25 = vmul.f32 1.442695, %v410_v23 }
 0x13e   :  { %v453_v26 = vpop.eup %452 }
 0x13f   :  { %v455_v28 = vpop.eup %454  ;;  %456 = vpow2.f32 %v261_v24  ;;  %v265_v30 = vsel %vm245_vm4, %v453_v26, 0.0 }
 0x140   :  { %458 = vpow2.f32 %v263_v25  ;;  %v266_v31 = vsel %vm246_vm5, %v455_v28, 0.0  ;;  %v269_v32 = vsel %vm103_vm1, %v265_v30, 0.0  ;;  %v556_v30 = vmov 32.0  }
 0x141   :  { %v272_v33 = vsel %vm103_vm1, %v266_v31, 0.0  ;;  %270 = vadd.xlane.f32.xlu0 %v269_v32 }
 0x142   :  { %273 = vadd.xlane.f32.xlu1 %v272_v33 }
 0x145   :  { %v457_v34 = vpop.eup %456 }
 0x146   :  { %v459_v35 = vpop.eup %458  ;;  %v267_v36 = vsel %vm247_vm8, %v457_v34, 0.0 }
 0x147   :  { %v268_v37 = vsel %vm248_vm9, %v459_v35, 0.0  ;;  %v275_v38 = vsel %vm103_vm1, %v267_v36, 0.0 }
 0x148   :  { %v278_v39 = vsel %vm103_vm1, %v268_v37, 0.0 }
 0x149   :  { %276 = vadd.xlane.f32.xlu0 %v275_v38 }
 0x14a   :  { %279 = vadd.xlane.f32.xlu1 %v278_v39 }
 0x151   :  { %322 = vadd.xlane.f32.xlu0 %v321_v44 }
 0x152   :  { %316 = vadd.xlane.f32.xlu1 %v315_v45 }
 0x159   :  { %78 = vadd.xlane.f32.xlu0 %v77_v48 }
 0x15a   :  { %325 = vadd.xlane.f32.xlu1 %v324_v49 }
 0x1a7   :  { %v320_v4 = vpop.xlane.xlu2 %319 }
 0x1a8   :  { %v332_v0 = vmul.f32 2.0, %v320_v4 }
 0x1b4   :  { %v271_v51 = vpop.xlane.xlu0 %270 }
 0x1b5   :  { %v274_v52 = vpop.xlane.xlu1 %273 }
 0x1b6   :  { %460 = vlog2.f32 %v274_v52 }
 0x1b7   :  { %462 = vlog2.f32 %v271_v51 }
 0x1bc   :  { %v277_v53 = vpop.xlane.xlu0 %276  ;;  %v461_v54 = vpop.eup %460 }
 0x1bd   :  { %v280_v55 = vpop.xlane.xlu1 %279  ;;  %464 = vlog2.f32 %v277_v53  ;;  %v463_v56 = vpop.eup %462  ;;  %v284_v57 = vmul.f32 0.6931472, %v461_v54 }
 0x1be   :  { %466 = vlog2.f32 %v66_v50  ;;  %v282_v58 = vmul.f32 0.6931472, %v463_v56 }
 0x1bf   :  { %468 = vlog2.f32 %v280_v55  ;;  %v290_v61 = vadd.f32 2.0, %v284_v57 }
 0x1c0   :  { %v289_v2 = vadd.f32 2.0, %v282_v58 }
 0x1c1   :  { %v336_v10 = vsub.f32 %v290_v61, %v332_v0 }
 0x1c3   :  { %v465_v59 = vpop.eup %464  ;;  %v344_v17 = vsel %vm81_vm0, %v336_v10, 0.0 }
 0x1c4   :  { %v467_v60 = vpop.eup %466  ;;  %v286_v62 = vmul.f32 0.6931472, %v465_v59  ;;  %v323_v63 = vpop.xlane.xlu0 %322 }
 0x1c5   :  { %v317_v1 = vpop.xlane.xlu1 %316  ;;  %v333_v7 = vmul.f32 2.0, %v323_v63  ;;  %v469_v8 = vpop.eup %468  ;;  %v68_v9 = vmul.f32 0.6931472, %v467_v60 }
 0x1c6   :  { %v291_v3 = vadd.f32 2.0, %v286_v62  ;;  %v331_v6 = vmul.f32 2.0, %v317_v1  ;;  %v288_v12 = vmul.f32 0.6931472, %v469_v8 }
 0x1c7   :  { %v69_v15 = vadd.f32 %v68_v9, %v637_v18  ;;  %v555_v18 = vmov 8.0  }
 0x1c8   :  { %v335_v11 = vsub.f32 %v289_v2, %v331_v6  ;;  %v337_v14 = vsub.f32 %v291_v3, %v333_v7  ;;  %v292_v22 = vadd.f32 2.0, %v288_v12  ;;  %470 = vrcp.f32 %v555_v18 }
 0x1c9   :  { %472 = vrcp.f32 %v556_v30 }
 0x1ca   :  { %v343_v13 = vsel %vm81_vm0, %v335_v11, 0.0  ;;  %v346_v24 = vsel %vm81_vm0, %v337_v14, 0.0 }
 0x1cb   :  { %v345_v21 = vadd.f32 %v344_v17, %v343_v13 }
 0x1cc   :  { %v79_v16 = vpop.xlane.xlu0 %78 }
 0x1cd   :  { %v326_v19 = vpop.xlane.xlu1 %325  ;;  %v80_v20 = vsub.f32 %v69_v15, %v79_v16  ;;  %v347_v27 = vadd.f32 %v346_v24, %v345_v21 }
 0x1ce   :  { %v334_v23 = vmul.f32 2.0, %v326_v19  ;;  %v471_v31 = vpop.eup %470 }
 0x1cf   :  { %v82_v25 = vsel %vm81_vm0, %v80_v20, 0.0  ;;  %v93_v32 = vmul.f32 8.0, %v471_v31  ;;  %v473_v33 = vpop.eup %472  ;;  %vm97_vm1 = vweird.f32 %v471_v31 }
 0x1d0   :  { %v338_v26 = vsub.f32 %v292_v22, %v334_v23  ;;  %83 = vadd.xlane.f32.xlu1 %v82_v25  ;;  %v361_v36 = vmul.f32 32.0, %v473_v33  ;;  %vm365_vm14 = vweird.f32 %v473_v33 }
 0x1d1   :  { %v94_v34 = vsub.f32 1.0, %v93_v32 }
 0x1d2   :  { %v348_v28 = vsel %vm81_vm0, %v338_v26, 0.0  ;;  %v362_v40 = vsub.f32 1.0, %v361_v36 }
 0x1d3   :  { %v349_v29 = vadd.f32 %v348_v28, %v347_v27  ;;  %v95_v39 = vmul.f32 %v471_v31, %v94_v34 }
 0x1d4   :  { %v363_v47 = vmul.f32 %v473_v33, %v362_v40 }
 0x1d5   :  { %350 = vadd.xlane.f32.xlu0 %v349_v29  ;;  %v96_v45 = vadd.f32 %v471_v31, %v95_v39 }
 0x1d6   :  { %v364_v53 = vadd.f32 %v473_v33, %v363_v47 }
 0x1d7   :  { %v98_v51 = vsel %vm97_vm1, %v471_v31, %v96_v45 }
 0x1d8   :  { %v366_v56 = vsel %vm365_vm14, %v473_v33, %v364_v53 }
 0x243   :  { %v84_v35 = vpop.xlane.xlu1 %83 }
 0x244   :  { %v85_v37 = vrot.slane %v84_v35, 4 }
 0x246   :  { %v86_v38 = vadd.f32 %v85_v37, %v84_v35 }
 0x248   :  { %v87_v41 = vrot.slane %v86_v38, 2  ;;  %v351_v42 = vpop.xlane.xlu0 %350 }
 0x249   :  { %v352_v43 = vrot.slane %v351_v42, 4 }
 0x24a   :  { %v88_v44 = vadd.f32 %v87_v41, %v86_v38 }
 0x24b   :  { %v353_v46 = vadd.f32 %v352_v43, %v351_v42 }
 0x24c   :  { %v89_v48 = vrot.slane %v88_v44, 1 }
 0x24d   :  { %v354_v49 = vrot.slane %v353_v46, 2 }
 0x24e   :  { %v90_v50 = vadd.f32 %v89_v48, %v88_v44 }
 0x24f   :  { %v355_v52 = vadd.f32 %v354_v49, %v353_v46 }
 0x250   :  { %426 = vpush %v90_v50 }
 0x251   :  { %428 = vpush %v98_v51  ;;  %v356_v54 = vrot.slane %v355_v52, 1 }
 0x253   :  { %v357_v55 = vadd.f32 %v356_v54, %v355_v52 }
 0x255   :  { %430 = vpush %v357_v55 }
 0x256   :  { %432 = vpush %v366_v56 }
 0x281   :  { %s427_s4 = spop %426 }
 0x282   :  { %s429_s5 = spop %428 }
 0x283   :  { %s100_s14 = smul.f32 %s429_s5, %s427_s4 }
 0x285   :  { %v374_v57 = vstv %s100_s14 }
 0x286   :  { %s431_s15 = spop %430  ;;  %v375_v4 = vsel %vm373_vm15, %v374_v57, 0.0 }
 0x287   :  { %s433_s16 = spop %432 }
 0x288   :  { %s368_s17 = smul.f32 %s433_s16, %s431_s15 }
 0x28a   :  { %s369_s23 = sadd.f32 %s368_s17, %s100_s14  ;;  %v376_v58 = vstv %s368_s17 }
 0x28b   :  { %v377_v59 = vsel %vm372_vm2, %v376_v58, %v375_v4 }
 0x28c   :  { %v378_v60 = vstv %s369_s23 }
 0x28d   :  { %v379_v61 = vsel %vm371_vm3, %v378_v60, %v377_v59 }
 0x28e   :  { %380 = vst [vmem:[#allocation8] sm:$0x1] %v379_v61 }
 0x28f   :  { %391 = dma.vmem_to_hbm [thread:$0]  %s387_s19, 16, %s389_s22, [#allocation5]  }
 0x290   :  { %550 = dma.done.wait [#allocation5], 16  }
 0x291   :  { %551 = vsyncadd [#allocation5], 4294967280 }
 0x292   :  { %396 = vsyncpa [#allocation4], 1 }
 0x293   :  { %397 = vsyncpa [#allocation7], 1 }
 0x294   :  { %398 = vsyncpa [#allocation5], 1 }

</bundles_post_ra>
